<compile_context>
chip_gen: v5e
topology: v5e:2x2
jax: 0.10.0
libtpu: 0.0.40
codegen_flags: <defaults>
</compile_context>

<pallas_src>
import jax
import jax.numpy as jnp
from jax import lax
from jax.experimental import pallas as pl
from jax.experimental.pallas import tpu as pltpu

n_embd = 64        # C
block_size = 180   # max context (only tril[:T,:T] is used)
dropout_p = 0.2    # TODO(synk): dropout applied as identity (eval mode) for determinism


def attention_head_kernel(x_ref, wqkv_ref, bqkv_ref, o_ref):
    Bb, T, C = x_ref.shape
    H = o_ref.shape[-1]

    x = x_ref[...]                                           # (Bb, T, C), native dtype

    # ---- fused QKV projection: (Bb, T, C) @ (C, 3H) -> (Bb, T, 3H) ---------
    qkv = lax.dot_general(
        x, wqkv_ref[...],
        dimension_numbers=(((2,), (0,)), ((), ())),
        preferred_element_type=jnp.float32) + bqkv_ref[...]

    q = qkv[:, :, 0:H]                                       # (Bb, T, H)
    k = qkv[:, :, H:2 * H]
    v = qkv[:, :, 2 * H:3 * H]

    # Fold PyTorch's C ** -0.5 scale into q (cheaper than scaling the TxT scores).
    q = q * (C ** -0.5)

    # ---- scores: batched NT matmul, no explicit k.T ------------------------
    wei = lax.dot_general(
        q, k,
        dimension_numbers=(((2,), (2,)), ((0,), (0,))),
        preferred_element_type=jnp.float32)                  # (Bb, T, T)

    # ---- causal mask (computed once, broadcast over the batch block) -------
    row = lax.broadcasted_iota(jnp.int32, (T, T), 0)
    col = lax.broadcasted_iota(jnp.int32, (T, T), 1)
    wei = jnp.where((row >= col)[None, :, :], wei, -jnp.inf)

    # ---- numerically-stable softmax along last axis -------------------------
    m = jnp.max(wei, axis=-1, keepdims=True)
    p = jnp.exp(wei - m)
    denom = jnp.sum(p, axis=-1, keepdims=True)
    wei = p / denom                                          # exact for 1e-5 tol

    # ---- attention-weighted values: batched matmul --------------------------
    out = lax.dot_general(
        wei, v,
        dimension_numbers=(((2,), (1,)), ((0,), (0,))),
        preferred_element_type=jnp.float32)                  # (Bb, T, H)

    # TODO(synk): last dim is head_size=16 (<128 lanes) -> masked stores;
    # fusing multiple heads would make the writeback lane-dense.
    o_ref[...] = out.astype(o_ref.dtype)


def attention_head(x, wq, bq, wk, bk, wv, bv, *, batch_block=8):
    """x: (B, T, C); w*: (C, H); b*: (1, H). Returns (B, T, H)."""
    B, T, C = x.shape
    H = wq.shape[1]
    assert T <= block_size and C == n_embd

    # Fuse QKV weights/biases on the wrapper side: one (C, 3H) matmul in-kernel.
    wqkv = jnp.concatenate([wq, wk, wv], axis=1)   # (C, 3H)
    bqkv = jnp.concatenate([bq, bk, bv], axis=1)   # (1, 3H)

    # Largest divisor of B that is <= batch_block: big per-step tiles, while
    # large B still yields multiple parallel grid steps (2 TCs on v7x).
    Bb = min(batch_block, B)
    while B % Bb != 0:
        Bb -= 1

    return pl.pallas_call(
        attention_head_kernel,
        out_shape=jax.ShapeDtypeStruct((B, T, H), x.dtype),
        grid_spec=pltpu.PrefetchScalarGridSpec(
            num_scalar_prefetch=0,
            grid=(B // Bb,),
            in_specs=[
                pl.BlockSpec((Bb, T, C), lambda b: (b, 0, 0)),
                pl.BlockSpec((C, 3 * H), lambda b: (0, 0)),
                pl.BlockSpec((1, 3 * H), lambda b: (0, 0)),
            ],
            out_specs=pl.BlockSpec((Bb, T, H), lambda b: (b, 0, 0)),
        ),
        compiler_params=pltpu.CompilerParams(
            dimension_semantics=("parallel",)),
    )(x, wqkv, bqkv)


def _reference(x, wq, bq, wk, bk, wv, bv):
    """Plain-JAX reference matching the PyTorch forward (eval mode)."""
    B, T, C = x.shape
    q = x @ wq + bq
    k = x @ wk + bk
    v = x @ wv + bv
    wei = (q @ jnp.swapaxes(k, -2, -1)) * (C ** -0.5)
    mask = jnp.tril(jnp.ones((T, T), dtype=bool))
    wei = jnp.where(mask, wei, -jnp.inf)
    wei = jax.nn.softmax(wei, axis=-1)
    return wei @ v


if __name__ == "__main__":
    B, T, C = 2, 8, n_embd
    head_size = 16

    key = jax.random.PRNGKey(0)
    kx, k1, k2, k3, k4, k5, k6 = jax.random.split(key, 7)

    x = jax.random.normal(kx, (B, T, C), dtype=jnp.float32)

    # deterministic nn.Linear-style init: U(-1/sqrt(fan_in), 1/sqrt(fan_in))
    bound = 1.0 / (C ** 0.5)
    wq = jax.random.uniform(k1, (C, head_size), minval=-bound, maxval=bound, dtype=jnp.float32)
    bq = jax.random.uniform(k2, (1, head_size), minval=-bound, maxval=bound, dtype=jnp.float32)
    wk = jax.random.uniform(k3, (C, head_size), minval=-bound, maxval=bound, dtype=jnp.float32)
    bk = jax.random.uniform(k4, (1, head_size), minval=-bound, maxval=bound, dtype=jnp.float32)
    wv = jax.random.uniform(k5, (C, head_size), minval=-bound, maxval=bound, dtype=jnp.float32)
    bv = jax.random.uniform(k6, (1, head_size), minval=-bound, maxval=bound, dtype=jnp.float32)

    out = attention_head(x, wq, bq, wk, bk, wv, bv)
    out = jax.block_until_ready(out)

    ref = _reference(x, wq, bq, wk, bk, wv, bv)
    assert out.shape == (B, T, head_size)
    assert jnp.allclose(out, ref, atol=1e-5, rtol=1e-5), "mismatch vs reference"

    print("KERNEL_OK")
</pallas_src>

<mosaic_0001>
module attributes {stable_mosaic.version = 11 : i64} {
  func.func @attention_head_kernel(%arg0: i32, %arg1: memref<2x8x64xf32, #tpu.memory_space<vmem>>, %arg2: memref<64x48xf32, #tpu.memory_space<vmem>>, %arg3: memref<1x48xf32, #tpu.memory_space<vmem>>, %arg4: memref<2x8x16xf32, #tpu.memory_space<vmem>>) attributes {dimension_semantics = [#tpu.dimension_semantics<parallel>], iteration_bounds = array<i64: 1>, scalar_prefetch = 0 : i64, scratch_operands = 0 : i64, tpu.core_type = #tpu.core_type<tc>, window_params = [{transform_indices = @transform_0, window_bounds = array<i64: 2, 8, 64>}, {pipeline_mode = #tpu.pipeline_mode<synchronous>, transform_indices = @transform_1, window_bounds = array<i64: 64, 48>}, {pipeline_mode = #tpu.pipeline_mode<synchronous>, transform_indices = @transform_2, window_bounds = array<i64: 1, 48>}, {transform_indices = @transform_3, window_bounds = array<i64: 2, 8, 16>}]} {
    %c0 = arith.constant 0 : index
    %c0_0 = arith.constant 0 : index
    %c0_1 = arith.constant 0 : index
    %0 = vector.load %arg1[%c0, %c0_0, %c0_1] : memref<2x8x64xf32, #tpu.memory_space<vmem>>, vector<2x8x64xf32>
    %c0_2 = arith.constant 0 : index
    %c0_3 = arith.constant 0 : index
    %1 = vector.load %arg2[%c0_2, %c0_3] : memref<64x48xf32, #tpu.memory_space<vmem>>, vector<64x48xf32>
    %cst = arith.constant dense<0.000000e+00> : vector<2x8x48xf32>
    %2 = tpu.matmul %0, %1, %cst {dimension_numbers = #tpu.dot_dimension_numbers<[2], [0], [0, 1], [1], [0, 0, 0, 1, 1, 1], [], []>} : vector<2x8x64xf32>, vector<64x48xf32>, vector<2x8x48xf32> -> vector<2x8x48xf32>
    %c0_4 = arith.constant 0 : index
    %c0_5 = arith.constant 0 : index
    %3 = vector.load %arg3[%c0_4, %c0_5] : memref<1x48xf32, #tpu.memory_space<vmem>>, vector<1x48xf32>
    %4 = vector.shape_cast %3 : vector<1x48xf32> to vector<1x1x48xf32>
    %5 = vector.broadcast %4 : vector<1x1x48xf32> to vector<2x8x48xf32>
    %6 = arith.addf %2, %5 : vector<2x8x48xf32>
    %7 = vector.extract_strided_slice %6 {offsets = [0, 0, 0], sizes = [2, 8, 16], strides = [1, 1, 1]} : vector<2x8x48xf32> to vector<2x8x16xf32>
    %8 = vector.extract_strided_slice %6 {offsets = [0, 0, 16], sizes = [2, 8, 16], strides = [1, 1, 1]} : vector<2x8x48xf32> to vector<2x8x16xf32>
    %9 = vector.extract_strided_slice %6 {offsets = [0, 0, 32], sizes = [2, 8, 16], strides = [1, 1, 1]} : vector<2x8x48xf32> to vector<2x8x16xf32>
    %cst_6 = arith.constant 1.250000e-01 : f32
    %10 = vector.broadcast %cst_6 : f32 to vector<2x8x16xf32>
    %11 = arith.mulf %7, %10 : vector<2x8x16xf32>
    %cst_7 = arith.constant dense<0.000000e+00> : vector<2x8x8xf32>
    %12 = tpu.matmul %11, %8, %cst_7 {dimension_numbers = #tpu.dot_dimension_numbers<[2], [2], [1], [1], [0, 0, 0, 1, 1, 1], [0], [0]>} : vector<2x8x16xf32>, vector<2x8x16xf32>, vector<2x8x8xf32> -> vector<2x8x8xf32>
    %13 = tpu.iota {dimensions = array<i32: 0>} : vector<8x8xi32>
    %14 = tpu.iota {dimensions = array<i32: 1>} : vector<8x8xi32>
    %15 = arith.cmpi sge, %13, %14 : vector<8x8xi32>
    %16 = vector.shape_cast %15 : vector<8x8xi1> to vector<1x8x8xi1>
    %cst_8 = arith.constant 0xFF800000 : f32
    %17 = vector.shape_cast %16 : vector<1x8x8xi1> to vector<1x8x8xi1>
    %18 = vector.broadcast %17 : vector<1x8x8xi1> to vector<2x8x8xi1>
    %19 = vector.broadcast %cst_8 : f32 to vector<2x8x8xf32>
    %20 = arith.select %18, %12, %19 : vector<2x8x8xi1>, vector<2x8x8xf32>
    %cst_9 = arith.constant dense<0xFF800000> : vector<2x8xf32>
    %21 = vector.multi_reduction <maximumf>, %20, %cst_9 [2] : vector<2x8x8xf32> to vector<2x8xf32>
    %22 = vector.shape_cast %21 : vector<2x8xf32> to vector<2x8x1xf32>
    %23 = vector.broadcast %22 : vector<2x8x1xf32> to vector<2x8x8xf32>
    %24 = arith.subf %20, %23 : vector<2x8x8xf32>
    %25 = math.exp %24 : vector<2x8x8xf32>
    %cst_10 = arith.constant dense<0.000000e+00> : vector<2x8xf32>
    %26 = vector.multi_reduction <add>, %25, %cst_10 [2] : vector<2x8x8xf32> to vector<2x8xf32>
    %27 = vector.shape_cast %26 : vector<2x8xf32> to vector<2x8x1xf32>
    %28 = vector.broadcast %27 : vector<2x8x1xf32> to vector<2x8x8xf32>
    %29 = arith.divf %25, %28 : vector<2x8x8xf32>
    %cst_11 = arith.constant dense<0.000000e+00> : vector<2x8x16xf32>
    %30 = tpu.matmul %29, %9, %cst_11 {dimension_numbers = #tpu.dot_dimension_numbers<[2], [1], [1], [2], [0, 0, 0, 1, 1, 2], [0], [0]>} : vector<2x8x8xf32>, vector<2x8x16xf32>, vector<2x8x16xf32> -> vector<2x8x16xf32>
    %c0_12 = arith.constant 0 : index
    %c0_13 = arith.constant 0 : index
    %c0_14 = arith.constant 0 : index
    %31 = vector.load %arg4[%c0_12, %c0_13, %c0_14] : memref<2x8x16xf32, #tpu.memory_space<vmem>>, vector<2x8x16xf32>
    tpu.vector_store %arg4[%c0_12, %c0_13, %c0_14], %30 {strides = array<i32>} : memref<2x8x16xf32, #tpu.memory_space<vmem>>, vector<2x8x16xf32>,
    return
  }
  func.func @transform_0(%arg0: i32) -> (i32, i32, i32) {
    %c0_i32 = arith.constant 0 : i32
    %c0_i32_0 = arith.constant 0 : i32
    %c0_i32_1 = arith.constant 0 : i32
    return %arg0, %c0_i32, %c0_i32_0 : i32, i32, i32
  }
  func.func @transform_1(%arg0: i32) -> (i32, i32) {
    %c0_i32 = arith.constant 0 : i32
    %c0_i32_0 = arith.constant 0 : i32
    %c0_i32_1 = arith.constant 0 : i32
    return %c0_i32, %c0_i32_0 : i32, i32
  }
  func.func @transform_2(%arg0: i32) -> (i32, i32) {
    %c0_i32 = arith.constant 0 : i32
    %c0_i32_0 = arith.constant 0 : i32
    %c0_i32_1 = arith.constant 0 : i32
    return %c0_i32, %c0_i32_0 : i32, i32
  }
  func.func @transform_3(%arg0: i32) -> (i32, i32, i32) {
    %c0_i32 = arith.constant 0 : i32
    %c0_i32_0 = arith.constant 0 : i32
    %c0_i32_1 = arith.constant 0 : i32
    return %arg0, %c0_i32, %c0_i32_0 : i32, i32, i32
  }
}

</mosaic_0001>

<bundles_post_ra>
// kernel: tpu_custom_call.1
= control target key start
LH: loop header
LB: loop body
LE: loop exit
PB: predicated region body
PF: predicated region fallthrough
CT: control target
= control target key end

     0   :  { %s369_s0 = inlined_call_operand.vmem [shape: f32[2,8,64], index: 0, kind: input, shape index: {}]   ;;  %s370_s1 = inlined_call_operand.vmem [shape: f32[64,48], index: 1, kind: input, shape index: {}]   ;;  %s371_s2 = inlined_call_operand.vmem [shape: f32[1,48], index: 2, kind: input, shape index: {}]   ;;  %s372_s3 = inlined_call_operand.hbm [shape: f32[2,8,16], index: 3, kind: output, shape index: {}]  }
   0x1   :  { %v24_v0 = vld [vmem:[%s370_s1 + $0x38] sm:$0xff]  ;;  %v23_v1 = vld [vmem:[%s370_s1 + $0x30] sm:$0xff]  ;;  %v22_v2 = vld [vmem:[%s370_s1 + $0x28] sm:$0xff] }
   0x2   :  { %44 = vmatpush.msra.mxu0 %v24_v0  ;;  %v21_v3 = vld [vmem:[%s370_s1 + $0x20] sm:$0xff] }
   0x4   :  { %45 = vmatpush.msra.mxu0 %v23_v1 }
   0x5   :  { %8 = vsyncpa [#allocation3], 0  ;;  %v20_v4 = vld [vmem:[%s370_s1 + $0x18] sm:$0xff]  ;;  %v19_v5 = vld [vmem:[%s370_s1 + $0x10] sm:$0xff]  ;;  %vm29_vm0 = vcmask 523264   ;;  %s297_s7 = smov 96   ;;  %v118_v20 = vlaneseq }
   0x6   :  { %46 = vmatpush.msra.mxu0 %v22_v2  ;;  %v18_v6 = vld [vmem:[%s370_s1 + $0x8] sm:$0xff]  ;;  %v17_v7 = vld [vmem:[%s370_s1] sm:$0xff]  ;;  %s296_s1 = smov 112   ;;  %vm64_vm1 = vcmask 130048   ;;  %vm127_vm3 = vcmask 64512   ;;  %s236_s10 = sshll.u32 %s372_s3, 4  ;;  %s237_s10 = int_to_ptr.hbm [resolvable:$true] %s236_s10 }
   0x7   :  { %v15_v8 = vld [vmem:[%s369_s0] sm:$0xff]  ;;  %v16_v9 = vld [vmem:[%s369_s0 + $0x8] sm:$0xff]  ;;  %v119_v21 = vshrl.u32 %v118_v20, 7  ;;  %v121_v22 = vand.u32 127, %v118_v20  ;;  %s298_s0 = smov [#allocation2]   ;;  %s299_s11 = smov 128  }
   0x8   :  { %47 = vmatpush.msra.mxu0 %v21_v3  ;;  %v261_v10 = vld [vmem:[%s371_s2] ss:$0 sm:$0xff]  ;;  %s234_s2 = sshll.u32 %s298_s0, 4  ;;  %s300_s12 = smov 8   ;;  %s235_s2 = int_to_ptr.vmem [resolvable:$true] %s234_s2 }
   0x9   :  { %vm122_vm2 = vcmp.ge.s32.totalorder %v119_v21, %v121_v22 }
   0xa   :  { %48 = vmatpush.msra.mxu0 %v20_v4 }
   0xc   :  { %49 = vmatpush.msra.mxu0 %v19_v5 }
   0xe   :  { %50 = vmatpush.msra.mxu0 %v18_v6 }
  0x10   :  { %51 = vmatpush.msra.mxu0 %v17_v7 }
  0x11   :  { %248 = vmatmul.msk.f32.vlgmr.msra.gmra.mxu0 %vm29_vm0, %v15_v8 }
  0x19   :  { %249 = vmatmul.msk.f32.gmra.mxu0 %vm29_vm0, %v16_v9 }
  0x8e   :  { %v53_v11 = vpop.f32.mrf.mxu0 }
  0x8f   :  { %v54_v12 = vadd.f32 %v261_v10, %v53_v11 }
  0x91   :  { %62 = vrot.lane.b32.xlu0 %v54_v12, %s296_s1  ;;  %v59_v16 = vmul.f32 0.125, %v54_v12 }
  0x96   :  { %v56_v13 = vpop.f32.mrf.mxu0 }
  0x97   :  { %v57_v14 = vadd.f32 %v261_v10, %v56_v13 }
  0x99   :  { %91 = vrot.lane.b32.xlu0 %v57_v14, %s296_s1  ;;  %v60_v18 = vmul.f32 0.125, %v57_v14 }
  0xa1   :  { %176 = vrot.lane.b32.xlu0 %v54_v12, %s297_s7 }
 0x103   :  { %v63_v15 = vpop.permute.xlu0 %62 }
 0x104   :  { %250 = vmatpush.xpose.msk.msra.mxu1 %vm64_vm1, %v63_v15 }
 0x107   :  { %251 = vmatmul.msk.f32.vlgmr.msra.gmra.mxu1 %vm64_vm1, %v59_v16 }
 0x10b   :  { %v92_v17 = vpop.permute.xlu0 %91 }
 0x10c   :  { %252 = vmatpush.xpose.msk.msra.mxu2 %vm64_vm1, %v92_v17 }
 0x10f   :  { %253 = vmatmul.msk.f32.vlgmr.msra.gmra.mxu2 %vm64_vm1, %v60_v18 }
 0x113   :  { %v177_v19 = vpop.permute.xlu0 %176 }
 0x114   :  { %197 = vmatpush.msra.mxu3 %v177_v19 }
 0x184   :  { %v87_v23 = vpop.f32.mrf.mxu1 }
 0x185   :  { %v125_v24 = vsel %vm122_vm2, %v87_v23, -inf }
 0x186   :  { %v128_v25 = vsel %vm127_vm3, %v125_v24, -inf }
 0x187   :  { %129 = vmax.xlane.f32.xlu1 %v128_v25 }
 0x192   :  { %v115_v26 = vpop.f32.mrf.mxu2 }
 0x193   :  { %v126_v27 = vsel %vm122_vm2, %v115_v26, -inf }
 0x194   :  { %v131_v28 = vsel %vm127_vm3, %v126_v27, -inf }
 0x195   :  { %132 = vmax.xlane.f32.xlu1 %v131_v28 }
 0x1ae   :  { %202 = vrot.lane.b32.xlu1 %v57_v14, %s297_s7 }
 0x1fa   :  { %v130_v29 = vpop.xlane.xlu1 %129 }
 0x1fb   :  { %v134_v30 = vsub.f32 %v125_v24, %v130_v29 }
 0x1fd   :  { %v136_v31 = vmul.f32 1.442695, %v134_v30 }
 0x1ff   :  { %262 = vpow2.f32 %v136_v31 }
 0x205   :  { %v263_v32 = vpop.eup %262 }
 0x206   :  { %v140_v33 = vsel %vm127_vm3, %v263_v32, 0.0 }
 0x207   :  { %141 = vadd.xlane.f32.xlu2 %v140_v33 }
 0x208   :  { %v133_v34 = vpop.xlane.xlu1 %132 }
 0x209   :  { %v135_v35 = vsub.f32 %v126_v27, %v133_v34 }
 0x20b   :  { %v138_v36 = vmul.f32 1.442695, %v135_v35 }
 0x20d   :  { %264 = vpow2.f32 %v138_v36 }
 0x213   :  { %v265_v37 = vpop.eup %264 }
 0x214   :  { %v143_v38 = vsel %vm127_vm3, %v265_v37, 0.0 }
 0x215   :  { %144 = vadd.xlane.f32.xlu2 %v143_v38 }
 0x220   :  { %v203_v39 = vpop.permute.xlu1 %202 }
 0x221   :  { %223 = vmatpush.msrb.mxu3 %v203_v39 }
 0x27a   :  { %v142_v40 = vpop.xlane.xlu2 %141 }
 0x27b   :  { %266 = vrcp.f32 %v142_v40  ;;  %v157_v44 = vand.u32 2147483648, %v142_v40  ;;  %v155_v46 = vand.u32 2147483647, %v142_v40  ;;  %vm151_vm5 = vweird.f32 %v142_v40 }
 0x27d   :  { %v158_v49 = vor.u32 1.1754944e-38, %v157_v44  ;;  %vm156_vm7 = vcmp.eq.f32.partialorder %v155_v46, 8.507059e+37 }
 0x281   :  { %v267_v41 = vpop.eup %266 }
 0x282   :  { %v147_v42 = vmul.f32 %v267_v41, %v142_v40  ;;  %vm152_vm4 = vweird.f32 %v267_v41 }
 0x283   :  { %vm153_vm6 = vmor %vm151_vm5, %vm152_vm4 }
 0x284   :  { %v148_v43 = vsub.f32 1.0, %v147_v42 }
 0x286   :  { %v149_v45 = vmul.f32 %v267_v41, %v148_v43 }
 0x288   :  { %v145_v47 = vpop.xlane.xlu2 %144  ;;  %v150_v48 = vadd.f32 %v267_v41, %v149_v45 }
 0x289   :  { %268 = vrcp.f32 %v145_v47  ;;  %v172_v56 = vand.u32 2147483648, %v145_v47  ;;  %v170_v58 = vand.u32 2147483647, %v145_v47  ;;  %vm166_vm9 = vweird.f32 %v145_v47 }
 0x28a   :  { %v154_v50 = vsel %vm153_vm6, %v267_v41, %v150_v48 }
 0x28b   :  { %v159_v51 = vsel %vm156_vm7, %v158_v49, %v154_v50  ;;  %v173_v60 = vor.u32 1.1754944e-38, %v172_v56  ;;  %vm171_vm11 = vcmp.eq.f32.partialorder %v170_v58, 8.507059e+37 }
 0x28c   :  { %v160_v52 = vmul.f32 %v263_v32, %v159_v51 }
 0x28e   :  { %254 = vmatmul.msk.f32.vlgmr.msra.gmra.mxu3 %vm127_vm3, %v160_v52 }
 0x28f   :  { %v269_v53 = vpop.eup %268 }
 0x290   :  { %v162_v54 = vmul.f32 %v269_v53, %v145_v47  ;;  %vm167_vm8 = vweird.f32 %v269_v53 }
 0x291   :  { %vm168_vm10 = vmor %vm166_vm9, %vm167_vm8 }
 0x292   :  { %v163_v55 = vsub.f32 1.0, %v162_v54 }
 0x294   :  { %v164_v57 = vmul.f32 %v269_v53, %v163_v55 }
 0x296   :  { %v165_v59 = vadd.f32 %v269_v53, %v164_v57 }
 0x298   :  { %v169_v61 = vsel %vm168_vm10, %v269_v53, %v165_v59 }
 0x299   :  { %v174_v62 = vsel %vm171_vm11, %v173_v60, %v169_v61 }
 0x29a   :  { %v175_v63 = vmul.f32 %v265_v37, %v174_v62 }
 0x29c   :  { %255 = vmatmul.msk.f32.vlgmr.msrb.gmra.mxu3 %vm127_vm3, %v175_v63 }
 0x311   :  { %v199_v0 = vpop.f32.mrf.mxu3 }
 0x312   :  { %228 = vst.msk [vmem:[#allocation2] sm:$0xff] %vm64_vm1, %v199_v0 }
 0x31f   :  { %v225_v1 = vpop.f32.mrf.mxu3 }
 0x320   :  { %229 = vst.msk [vmem:[#allocation2 + $0x8] sm:$0xff] %vm64_vm1, %v225_v1 }
 0x321   :  { %242 = dma.vmem_to_hbm [thread:$0]  %s235_s2, 256, %s237_s10, [#allocation3], %s299_s11, %s299_s11, %s300_s12  }
 0x322   :  { %294 = dma.done.wait [#allocation3], 256  }
 0x323   :  { %295 = vsyncadd [#allocation3], 4294967040 }
 0x324   :  { %247 = vsyncpa [#allocation3], 1 }

</bundles_post_ra>
